<compile_context>
chip_gen: v6e
topology: v6e:2x2x1
jax: 0.10.0
libtpu: 0.0.40
codegen_flags: <defaults>
</compile_context>

<pallas_src>
import functools
import math

import jax
import jax.numpy as jnp
import numpy as np
from jax.experimental import pallas as pl
from jax.experimental.pallas import tpu as pltpu

D_MODEL = 32
HEADS = 4
D_KEY = D_MODEL // HEADS
BATCH = 2
SEQ = 8


def mha_kernel(q_ref, k_ref, v_ref,
               wq_ref, bq_ref, wkT_ref, bkT_ref, wv_ref, bv_ref,
               wo_ref, bo_ref, kmask_ref, vmask_ref,
               out_ref, *, heads):
    """One grid step == one independent attention instance (one batch element).

    q_ref/k_ref/v_ref : (1, S, D) activations for this instance
    wq_ref, bq_ref    : (D, D), (1, D)   Wq and bq, pre-scaled by 1/sqrt(d_key)
    wkT_ref, bkT_ref  : (D, D), (D, 1)   Wk^T and bk^T (K emitted transposed)
    wv_ref, bv_ref    : (D, D), (1, D)
    wo_ref, bo_ref    : (D, D), (1, D)
    kmask_ref         : (D, H*S) constant 0/1 block-diagonal head mask
    vmask_ref         : (H*S, D) constant 0/1 block-diagonal head mask
    out_ref           : (1, S, D)
    """
    q = q_ref[0]                                    # (S, D)
    k = k_ref[0]
    v = v_ref[0]

    # Input projections: canonical matmuls whose results land in columns 0:D
    # (no lane slicing). The 1/sqrt(d_key) scale is pre-folded into Wq/bq.
    qp = jnp.dot(q, wq_ref[...], preferred_element_type=jnp.float32) + bq_ref[...]
    vp = jnp.dot(v, wv_ref[...], preferred_element_type=jnp.float32) + bv_ref[...]

    # K projection emitted already transposed: contract the last dims of
    # Wk^T (D, D) and k (S, D). Only the small (S, D) activation is implicitly
    # transposed; the score matmul below stays a canonical (M, K) @ (K, N).
    kpT = jax.lax.dot_general(
        wkT_ref[...], k, (((1,), (1,)), ((), ())),
        preferred_element_type=jnp.float32) + bkT_ref[...]          # (D, S)

    # Block-diagonal head layout via constant 0/1 masks: no runtime iota/div,
    # no per-head loop, no concatenate of head outputs.
    kT_bd = jnp.tile(kpT, (1, heads)) * kmask_ref[...]              # (D, H*S)
    v_bd = jnp.tile(vp, (heads, 1)) * vmask_ref[...]                # (H*S, D)

    # scores[:, h*S:(h+1)*S] == q_h @ k_h^T / sqrt(d_key).
    # NOTE: no softmax -- the reference module discards the softmax output and
    # uses dropout(scores) (identity in eval mode) as the attention weights.
    scores = jnp.dot(qp, kT_bd, preferred_element_type=jnp.float32)  # (S, H*S)

    # Context lands directly in (S, D) with each head in its output columns.
    ctx = jnp.dot(scores, v_bd, preferred_element_type=jnp.float32)  # (S, D)

    out = jnp.dot(ctx, wo_ref[...], preferred_element_type=jnp.float32) + bo_ref[...]
    out_ref[0] = out.astype(out_ref.dtype)


def multi_head_attention(q, k, v, prepared_params):
    """q, k, v: (B, S, D) float32. `prepared_params` comes from prepare_params()."""
    (wq_s, bq_s, wkT, bkT, wv, bv, wo, bo, kmask, vmask) = prepared_params
    B, S, D = q.shape
    HS = HEADS * S

    rows = lambda b: (b, 0, 0)       # per-instance activation/output blocks
    whole = lambda b: (0, 0)         # weights/masks: resident, fetched once

    kernel = functools.partial(mha_kernel, heads=HEADS)
    return pl.pallas_call(
        kernel,
        out_shape=jax.ShapeDtypeStruct((B, S, D), jnp.float32),
        grid=(B,),
        in_specs=[
            pl.BlockSpec((1, S, D), rows),   # q
            pl.BlockSpec((1, S, D), rows),   # k
            pl.BlockSpec((1, S, D), rows),   # v
            pl.BlockSpec((D, D), whole),     # Wq (scaled)
            pl.BlockSpec((1, D), whole),     # bq (scaled)
            pl.BlockSpec((D, D), whole),     # Wk^T
            pl.BlockSpec((D, 1), whole),     # bk^T
            pl.BlockSpec((D, D), whole),     # Wv
            pl.BlockSpec((1, D), whole),     # bv
            pl.BlockSpec((D, D), whole),     # Wo
            pl.BlockSpec((1, D), whole),     # bo
            pl.BlockSpec((D, HS), whole),    # K-side head mask
            pl.BlockSpec((HS, D), whole),    # V-side head mask
        ],
        out_specs=pl.BlockSpec((1, S, D), rows),
        compiler_params=pltpu.CompilerParams(
            dimension_semantics=("parallel",)),   # shard instances over TCs (v7x)
    )(q, k, v, wq_s, bq_s, wkT, bkT, wv, bv, wo, bo, kmask, vmask)


def init_params(key):
    """Deterministic PyTorch-Linear-style init: U(-1/sqrt(fan_in), 1/sqrt(fan_in))."""
    bound = 1.0 / math.sqrt(D_MODEL)
    keys = jax.random.split(key, 8)

    def w(kk):  # (in, out) layout == PyTorch weight transposed
        return jax.random.uniform(kk, (D_MODEL, D_MODEL), jnp.float32, -bound, bound)

    def b(kk):
        return jax.random.uniform(kk, (1, D_MODEL), jnp.float32, -bound, bound)

    wq, bq = w(keys[0]), b(keys[1])
    wk, bk = w(keys[2]), b(keys[3])
    wv, bv = w(keys[4]), b(keys[5])
    wo, bo = w(keys[6]), b(keys[7])
    return (wq, bq, wk, bk, wv, bv, wo, bo)


def prepare_params(params, seq=SEQ):
    """One-time parameter prep: fold 1/sqrt(d_key) into Wq/bq, pre-transpose the
    K weight/bias, and precompute the constant block-diagonal head masks."""
    wq, bq, wk, bk, wv, bv, wo, bo = params
    d = wq.shape[0]
    d_key = d // HEADS
    scale = 1.0 / math.sqrt(d_key)

    wq_s, bq_s = wq * scale, bq * scale
    wkT, bkT = wk.T, bk.T                                  # (D, D), (D, 1)

    # Constant 0/1 masks carving the block-diagonal head structure.
    hs = HEADS * seq
    col_head = np.arange(hs) // seq                        # score/context block -> head
    feat_head = np.arange(d) // d_key                      # feature column -> head
    kmask = (feat_head[:, None] == col_head[None, :]).astype(np.float32)   # (D, H*S)
    vmask = kmask.T.copy()                                                  # (H*S, D)

    return (wq_s, bq_s, wkT, bkT, wv, bv, wo, bo,
            jnp.asarray(kmask), jnp.asarray(vmask))


def reference(q, k, v, params):
    """Plain-JAX reproduction of the PyTorch module's literal eval-mode forward."""
    wq, bq, wk, bk, wv, bv, wo, bo = params
    B, S, D = q.shape

    def split_heads(x):  # (B, S, D) -> (B, H, S, d_key)
        return x.reshape(B, S, HEADS, D_KEY).transpose(0, 2, 1, 3)

    qh = split_heads(q @ wq + bq)
    kh = split_heads(k @ wk + bk)
    vh = split_heads(v @ wv + bv)

    scores = jnp.einsum("bhqd,bhkd->bhqk", qh, kh) / math.sqrt(D_KEY)
    probs = scores  # softmax discarded / dropout identity, per reference code
    ctx = jnp.einsum("bhqk,bhkd->bhqd", probs, vh)
    ctx = ctx.transpose(0, 2, 1, 3).reshape(B, S, D)
    return ctx @ wo + bo


if __name__ == "__main__":
    key = jax.random.PRNGKey(0)
    kq, kk, kv, kp = jax.random.split(key, 4)

    q = jax.random.normal(kq, (BATCH, SEQ, D_MODEL), jnp.float32)
    k = jax.random.normal(kk, (BATCH, SEQ, D_MODEL), jnp.float32)
    v = jax.random.normal(kv, (BATCH, SEQ, D_MODEL), jnp.float32)
    params = init_params(kp)
    prepared = prepare_params(params)

    mha = jax.jit(multi_head_attention)
    out = jax.block_until_ready(mha(q, k, v, prepared))

    ref = reference(q, k, v, params)
    assert out.shape == (BATCH, SEQ, D_MODEL)
    assert jnp.allclose(out, ref, atol=1e-4, rtol=1e-3), "mismatch vs JAX reference"

    print("KERNEL_OK")
</pallas_src>

<mosaic_0001>
module attributes {stable_mosaic.version = 11 : i64} {
  func.func @mha_kernel(%arg0: i32, %arg1: memref<1x8x32xf32, #tpu.memory_space<vmem>>, %arg2: memref<1x8x32xf32, #tpu.memory_space<vmem>>, %arg3: memref<1x8x32xf32, #tpu.memory_space<vmem>>, %arg4: memref<32x32xf32, #tpu.memory_space<vmem>>, %arg5: memref<1x32xf32, #tpu.memory_space<vmem>>, %arg6: memref<32x32xf32, #tpu.memory_space<vmem>>, %arg7: memref<32x1xf32, #tpu.memory_space<vmem>>, %arg8: memref<32x32xf32, #tpu.memory_space<vmem>>, %arg9: memref<1x32xf32, #tpu.memory_space<vmem>>, %arg10: memref<32x32xf32, #tpu.memory_space<vmem>>, %arg11: memref<1x32xf32, #tpu.memory_space<vmem>>, %arg12: memref<32x32xf32, #tpu.memory_space<vmem>>, %arg13: memref<32x32xf32, #tpu.memory_space<vmem>>, %arg14: memref<1x8x32xf32, #tpu.memory_space<vmem>>) attributes {dimension_semantics = [#tpu.dimension_semantics<parallel>], iteration_bounds = array<i64: 2>, scalar_prefetch = 0 : i64, scratch_operands = 0 : i64, tpu.core_type = #tpu.core_type<tc>, window_params = [{transform_indices = @transform_0, window_bounds = array<i64: 1, 8, 32>}, {transform_indices = @transform_1, window_bounds = array<i64: 1, 8, 32>}, {transform_indices = @transform_2, window_bounds = array<i64: 1, 8, 32>}, {pipeline_mode = #tpu.pipeline_mode<synchronous>, transform_indices = @transform_3, window_bounds = array<i64: 32, 32>}, {pipeline_mode = #tpu.pipeline_mode<synchronous>, transform_indices = @transform_4, window_bounds = array<i64: 1, 32>}, {pipeline_mode = #tpu.pipeline_mode<synchronous>, transform_indices = @transform_5, window_bounds = array<i64: 32, 32>}, {pipeline_mode = #tpu.pipeline_mode<synchronous>, transform_indices = @transform_6, window_bounds = array<i64: 32, 1>}, {pipeline_mode = #tpu.pipeline_mode<synchronous>, transform_indices = @transform_7, window_bounds = array<i64: 32, 32>}, {pipeline_mode = #tpu.pipeline_mode<synchronous>, transform_indices = @transform_8, window_bounds = array<i64: 1, 32>}, {pipeline_mode = #tpu.pipeline_mode<synchronous>, transform_indices = @transform_9, window_bounds = array<i64: 32, 32>}, {pipeline_mode = #tpu.pipeline_mode<synchronous>, transform_indices = @transform_10, window_bounds = array<i64: 1, 32>}, {pipeline_mode = #tpu.pipeline_mode<synchronous>, transform_indices = @transform_11, window_bounds = array<i64: 32, 32>}, {pipeline_mode = #tpu.pipeline_mode<synchronous>, transform_indices = @transform_12, window_bounds = array<i64: 32, 32>}, {transform_indices = @transform_13, window_bounds = array<i64: 1, 8, 32>}]} {
    %c0 = arith.constant 0 : index
    %c0_0 = arith.constant 0 : index
    %c0_1 = arith.constant 0 : index
    %0 = vector.load %arg1[%c0, %c0_0, %c0_1] : memref<1x8x32xf32, #tpu.memory_space<vmem>>, vector<1x8x32xf32>
    %1 = vector.shape_cast %0 : vector<1x8x32xf32> to vector<8x32xf32>
    %c0_2 = arith.constant 0 : index
    %c0_3 = arith.constant 0 : index
    %c0_4 = arith.constant 0 : index
    %2 = vector.load %arg2[%c0_2, %c0_3, %c0_4] : memref<1x8x32xf32, #tpu.memory_space<vmem>>, vector<1x8x32xf32>
    %3 = vector.shape_cast %2 : vector<1x8x32xf32> to vector<8x32xf32>
    %c0_5 = arith.constant 0 : index
    %c0_6 = arith.constant 0 : index
    %c0_7 = arith.constant 0 : index
    %4 = vector.load %arg3[%c0_5, %c0_6, %c0_7] : memref<1x8x32xf32, #tpu.memory_space<vmem>>, vector<1x8x32xf32>
    %5 = vector.shape_cast %4 : vector<1x8x32xf32> to vector<8x32xf32>
    %c0_8 = arith.constant 0 : index
    %c0_9 = arith.constant 0 : index
    %6 = vector.load %arg4[%c0_8, %c0_9] : memref<32x32xf32, #tpu.memory_space<vmem>>, vector<32x32xf32>
    %cst = arith.constant dense<0.000000e+00> : vector<8x32xf32>
    %7 = tpu.matmul %1, %6, %cst {dimension_numbers = #tpu.dot_dimension_numbers<[1], [0], [0], [1], [0, 0, 1, 1], [], []>} : vector<8x32xf32>, vector<32x32xf32>, vector<8x32xf32> -> vector<8x32xf32>
    %c0_10 = arith.constant 0 : index
    %c0_11 = arith.constant 0 : index
    %8 = vector.load %arg5[%c0_10, %c0_11] : memref<1x32xf32, #tpu.memory_space<vmem>>, vector<1x32xf32>
    %9 = vector.broadcast %8 : vector<1x32xf32> to vector<8x32xf32>
    %10 = arith.addf %7, %9 : vector<8x32xf32>
    %c0_12 = arith.constant 0 : index
    %c0_13 = arith.constant 0 : index
    %11 = vector.load %arg8[%c0_12, %c0_13] : memref<32x32xf32, #tpu.memory_space<vmem>>, vector<32x32xf32>
    %cst_14 = arith.constant dense<0.000000e+00> : vector<8x32xf32>
    %12 = tpu.matmul %5, %11, %cst_14 {dimension_numbers = #tpu.dot_dimension_numbers<[1], [0], [0], [1], [0, 0, 1, 1], [], []>} : vector<8x32xf32>, vector<32x32xf32>, vector<8x32xf32> -> vector<8x32xf32>
    %c0_15 = arith.constant 0 : index
    %c0_16 = arith.constant 0 : index
    %13 = vector.load %arg9[%c0_15, %c0_16] : memref<1x32xf32, #tpu.memory_space<vmem>>, vector<1x32xf32>
    %14 = vector.broadcast %13 : vector<1x32xf32> to vector<8x32xf32>
    %15 = arith.addf %12, %14 : vector<8x32xf32>
    %c0_17 = arith.constant 0 : index
    %c0_18 = arith.constant 0 : index
    %16 = vector.load %arg6[%c0_17, %c0_18] : memref<32x32xf32, #tpu.memory_space<vmem>>, vector<32x32xf32>
    %cst_19 = arith.constant dense<0.000000e+00> : vector<32x8xf32>
    %17 = tpu.matmul %16, %3, %cst_19 {dimension_numbers = #tpu.dot_dimension_numbers<[1], [1], [0], [0], [0, 0, 1, 0], [], []>} : vector<32x32xf32>, vector<8x32xf32>, vector<32x8xf32> -> vector<32x8xf32>
    %c0_20 = arith.constant 0 : index
    %c0_21 = arith.constant 0 : index
    %18 = vector.load %arg7[%c0_20, %c0_21] : memref<32x1xf32, #tpu.memory_space<vmem>>, vector<32x1xf32>
    %19 = vector.broadcast %18 : vector<32x1xf32> to vector<32x8xf32>
    %20 = arith.addf %17, %19 : vector<32x8xf32>
    %21 = tpu.concatenate %20, %20, %20, %20 in 1 : vector<32x8xf32>, vector<32x8xf32>, vector<32x8xf32>, vector<32x8xf32> -> vector<32x32xf32>
    %c0_22 = arith.constant 0 : index
    %c0_23 = arith.constant 0 : index
    %22 = vector.load %arg12[%c0_22, %c0_23] : memref<32x32xf32, #tpu.memory_space<vmem>>, vector<32x32xf32>
    %23 = arith.mulf %21, %22 : vector<32x32xf32>
    %24 = tpu.concatenate %15, %15, %15, %15 in 0 : vector<8x32xf32>, vector<8x32xf32>, vector<8x32xf32>, vector<8x32xf32> -> vector<32x32xf32>
    %c0_24 = arith.constant 0 : index
    %c0_25 = arith.constant 0 : index
    %25 = vector.load %arg13[%c0_24, %c0_25] : memref<32x32xf32, #tpu.memory_space<vmem>>, vector<32x32xf32>
    %26 = arith.mulf %24, %25 : vector<32x32xf32>
    %cst_26 = arith.constant dense<0.000000e+00> : vector<8x32xf32>
    %27 = tpu.matmul %10, %23, %cst_26 {dimension_numbers = #tpu.dot_dimension_numbers<[1], [0], [0], [1], [0, 0, 1, 1], [], []>} : vector<8x32xf32>, vector<32x32xf32>, vector<8x32xf32> -> vector<8x32xf32>
    %cst_27 = arith.constant dense<0.000000e+00> : vector<8x32xf32>
    %28 = tpu.matmul %27, %26, %cst_27 {dimension_numbers = #tpu.dot_dimension_numbers<[1], [0], [0], [1], [0, 0, 1, 1], [], []>} : vector<8x32xf32>, vector<32x32xf32>, vector<8x32xf32> -> vector<8x32xf32>
    %c0_28 = arith.constant 0 : index
    %c0_29 = arith.constant 0 : index
    %29 = vector.load %arg10[%c0_28, %c0_29] : memref<32x32xf32, #tpu.memory_space<vmem>>, vector<32x32xf32>
    %cst_30 = arith.constant dense<0.000000e+00> : vector<8x32xf32>
    %30 = tpu.matmul %28, %29, %cst_30 {dimension_numbers = #tpu.dot_dimension_numbers<[1], [0], [0], [1], [0, 0, 1, 1], [], []>} : vector<8x32xf32>, vector<32x32xf32>, vector<8x32xf32> -> vector<8x32xf32>
    %c0_31 = arith.constant 0 : index
    %c0_32 = arith.constant 0 : index
    %31 = vector.load %arg11[%c0_31, %c0_32] : memref<1x32xf32, #tpu.memory_space<vmem>>, vector<1x32xf32>
    %32 = vector.broadcast %31 : vector<1x32xf32> to vector<8x32xf32>
    %33 = arith.addf %30, %32 : vector<8x32xf32>
    %c0_33 = arith.constant 0 : index
    %c0_34 = arith.constant 0 : index
    %c0_35 = arith.constant 0 : index
    %34 = vector.load %arg14[%c0_33, %c0_34, %c0_35] : memref<1x8x32xf32, #tpu.memory_space<vmem>>, vector<1x8x32xf32>
    %35 = vector.shape_cast %34 : vector<1x8x32xf32> to vector<8x32xf32>
    %36 = vector.shape_cast %33 : vector<8x32xf32> to vector<1x8x32xf32>
    tpu.vector_store %arg14[%c0_33, %c0_34, %c0_35], %36 {strides = array<i32>} : memref<1x8x32xf32, #tpu.memory_space<vmem>>, vector<1x8x32xf32>,
    return
  }
  func.func @transform_0(%arg0: i32) -> (i32, i32, i32) {
    %c0_i32 = arith.constant 0 : i32
    %c0_i32_0 = arith.constant 0 : i32
    %c0_i32_1 = arith.constant 0 : i32
    return %arg0, %c0_i32, %c0_i32_0 : i32, i32, i32
  }
  func.func @transform_1(%arg0: i32) -> (i32, i32, i32) {
    %c0_i32 = arith.constant 0 : i32
    %c0_i32_0 = arith.constant 0 : i32
    %c0_i32_1 = arith.constant 0 : i32
    return %arg0, %c0_i32, %c0_i32_0 : i32, i32, i32
  }
  func.func @transform_2(%arg0: i32) -> (i32, i32, i32) {
    %c0_i32 = arith.constant 0 : i32
    %c0_i32_0 = arith.constant 0 : i32
    %c0_i32_1 = arith.constant 0 : i32
    return %arg0, %c0_i32, %c0_i32_0 : i32, i32, i32
  }
  func.func @transform_3(%arg0: i32) -> (i32, i32) {
    %c0_i32 = arith.constant 0 : i32
    %c0_i32_0 = arith.constant 0 : i32
    %c0_i32_1 = arith.constant 0 : i32
    return %c0_i32, %c0_i32_0 : i32, i32
  }
  func.func @transform_4(%arg0: i32) -> (i32, i32) {
    %c0_i32 = arith.constant 0 : i32
    %c0_i32_0 = arith.constant 0 : i32
    %c0_i32_1 = arith.constant 0 : i32
    return %c0_i32, %c0_i32_0 : i32, i32
  }
  func.func @transform_5(%arg0: i32) -> (i32, i32) {
    %c0_i32 = arith.constant 0 : i32
    %c0_i32_0 = arith.constant 0 : i32
    %c0_i32_1 = arith.constant 0 : i32
    return %c0_i32, %c0_i32_0 : i32, i32
  }
  func.func @transform_6(%arg0: i32) -> (i32, i32) {
    %c0_i32 = arith.constant 0 : i32
    %c0_i32_0 = arith.constant 0 : i32
    %c0_i32_1 = arith.constant 0 : i32
    return %c0_i32, %c0_i32_0 : i32, i32
  }
  func.func @transform_7(%arg0: i32) -> (i32, i32) {
    %c0_i32 = arith.constant 0 : i32
    %c0_i32_0 = arith.constant 0 : i32
    %c0_i32_1 = arith.constant 0 : i32
    return %c0_i32, %c0_i32_0 : i32, i32
  }
  func.func @transform_8(%arg0: i32) -> (i32, i32) {
    %c0_i32 = arith.constant 0 : i32
    %c0_i32_0 = arith.constant 0 : i32
    %c0_i32_1 = arith.constant 0 : i32
    return %c0_i32, %c0_i32_0 : i32, i32
  }
  func.func @transform_9(%arg0: i32) -> (i32, i32) {
    %c0_i32 = arith.constant 0 : i32
    %c0_i32_0 = arith.constant 0 : i32
    %c0_i32_1 = arith.constant 0 : i32
    return %c0_i32, %c0_i32_0 : i32, i32
  }
  func.func @transform_10(%arg0: i32) -> (i32, i32) {
    %c0_i32 = arith.constant 0 : i32
    %c0_i32_0 = arith.constant 0 : i32
    %c0_i32_1 = arith.constant 0 : i32
    return %c0_i32, %c0_i32_0 : i32, i32
  }
  func.func @transform_11(%arg0: i32) -> (i32, i32) {
    %c0_i32 = arith.constant 0 : i32
    %c0_i32_0 = arith.constant 0 : i32
    %c0_i32_1 = arith.constant 0 : i32
    return %c0_i32, %c0_i32_0 : i32, i32
  }
  func.func @transform_12(%arg0: i32) -> (i32, i32) {
    %c0_i32 = arith.constant 0 : i32
    %c0_i32_0 = arith.constant 0 : i32
    %c0_i32_1 = arith.constant 0 : i32
    return %c0_i32, %c0_i32_0 : i32, i32
  }
  func.func @transform_13(%arg0: i32) -> (i32, i32, i32) {
    %c0_i32 = arith.constant 0 : i32
    %c0_i32_0 = arith.constant 0 : i32
    %c0_i32_1 = arith.constant 0 : i32
    return %arg0, %c0_i32, %c0_i32_0 : i32, i32, i32
  }
}

</mosaic_0001>

<bundles_post_ra>
// kernel: multi_head_attention.1
= control target key start
LH: loop header
LB: loop body
LE: loop exit
PB: predicated region body
PF: predicated region fallthrough
CT: control target
= control target key end

     0   :  { %s2408_s0 = inlined_call_operand.hbm [shape: f32[2,8,32], index: 0, kind: input, shape index: {}]   ;;  %s2409_s1 = inlined_call_operand.hbm [shape: f32[2,8,32], index: 1, kind: input, shape index: {}]   ;;  %s2410_s2 = inlined_call_operand.hbm [shape: f32[2,8,32], index: 2, kind: input, shape index: {}]   ;;  %s2411_s3 = inlined_call_operand.vmem [shape: f32[32,32], index: 3, kind: input, shape index: {}]   ;;  %s2412_s4 = inlined_call_operand.vmem [shape: f32[1,32], index: 4, kind: input, shape index: {}]   ;;  %s2413_s5 = inlined_call_operand.hbm [shape: f32[32,32], index: 5, kind: input, shape index: {}]   ;;  %s2414_s6 = inlined_call_operand.vmem [shape: f32[32,1], index: 6, kind: input, shape index: {}]   ;;  %s2415_s7 = inlined_call_operand.hbm [shape: f32[32,32], index: 7, kind: input, shape index: {}]   ;;  %s2416_s8 = inlined_call_operand.vmem [shape: f32[1,32], index: 8, kind: input, shape index: {}]   ;;  %s2417_s9 = inlined_call_operand.hbm [shape: f32[32,32], index: 9, kind: input, shape index: {}]   ;;  %s2418_s10 = inlined_call_operand.vmem [shape: f32[1,32], index: 10, kind: input, shape index: {}]   ;;  %s2419_s11 = inlined_call_operand.hbm [shape: f32[32,32], index: 11, kind: input, shape index: {}]   ;;  %s2420_s12 = inlined_call_operand.hbm [shape: f32[32,32], index: 12, kind: input, shape index: {}]   ;;  %s2421_s13 = inlined_call_operand.hbm [shape: f32[2,8,32], index: 13, kind: output, shape index: {}]  }
   0x1   :  { %2445 = sst [smem:[#allocation29_spill]] %s2409_s1 }
   0x2   :  { %2446 = sst [smem:[#allocation30_spill]] %s2412_s4 }
   0x3   :  { %2447 = sst [smem:[#allocation31_spill]] %s2413_s5 }
   0x4   :  { %2448 = sst [smem:[#allocation32_spill]] %s2416_s8 }
   0x5   :  { %2449 = sst [smem:[#allocation33_spill]] %s2417_s9 }
   0x6   :  { %2450 = sst [smem:[#allocation34_spill]] %s2418_s10 }
   0x7   :  { %2451 = sst [smem:[#allocation35_spill]] %s2421_s13 }
   0x8   :  { %18 = vsyncpa [#allocation3], 0 }
   0x9   :  { %20 = vsyncpa [#allocation3 + $0x1], 0 }
   0xa   :  { %21 = vsyncpa [#allocation6], 0 }
   0xb   :  { %23 = vsyncpa [#allocation6 + $0x1], 0 }
   0xc   :  { %24 = vsyncpa [#allocation9], 0 }
   0xd   :  { %25 = vsyncpa [#allocation12], 0 }
   0xe   :  { %26 = vsyncpa [#allocation15], 0 }
   0xf   :  { %27 = vsyncpa [#allocation4], 0 }
  0x10   :  { %29 = vsyncpa [#allocation4 + $0x1], 0  ;;  %s2011_s25 = smov 0   ;;  %s2013_s26 = smov 0  }
  0x11   :  { %s2015_s27 = smov 0   ;;  %s2017_s28 = smov 0  }
  0x12 LB: > { %2452 = sst [smem:[#allocation23_spill]] %s1910_s25  ;;  %s1924_s29 = smov [#allocation8]   ;;  %s1922_s28 = sphi %s2017_s28, %s2494_s28   ;;  %s1918_s27 = sphi %s2015_s27, %s2498_s27   ;;  %s1914_s26 = sphi %s2013_s26, %s2497_s26   ;;  %s1910_s25 = sphi %s2011_s25, %s2496_s25  }
  0x13   : > { %2453 = sst [smem:[#allocation24_spill]] %s1922_s28  ;;  %s372_s30 = sshll.u32 %s1924_s29, 4  ;;  %s373_s30 = int_to_ptr.vmem [resolvable:$true] %s372_s30 }
  0x14   : > { %s2032_s14 = sadd.s32 4294967295, %s1922_s28   ;;  %p1378_p0 = scmp.ge.s32.totalorder %s1922_s28, 1 }
  0x15   : > { %p2436_p1 = scmp.eq.s32.totalorder %s2032_s14, 0  ;;  %p354_p2 = scmp.lt.s32.totalorder %s1922_s28, 3 }
  0x16   : > { %s1925_s16 = smov [#allocation11]   ;;  %s1639_s20 = scalar_lea.vmem %s373_s30, 512 }
  0x17   : > { %p2037_p3 = pnand %p1378_p0, %p354_p2  ;;  %s404_s17 = sshll.u32 %s1925_s16, 4  ;;  %s405_s17 = int_to_ptr.vmem [resolvable:$true] %s404_s17 }
  0x18   : > { %p1640_p8 = scmp.ne.s32.totalorder %s373_s30, %s1639_s20  ;;  %p1647_p11 = scmp.lt.s32.totalorder %s373_s30, %s373_s30 }
  0x19   : > { %s2454_s15 = scalar_select %p2037_p3, 1, 0 }
  0x1a   : > { %p1539_p5 = pneg %p2037_p3  ;;  %p1648_p12 = scmp.lt.s32.totalorder %s1639_s20, %s1639_s20 }
  0x1c   : > { %p2046_p6 = pnand %p1539_p5, %p2436_p1  ;;  %p1649_p13 = por %p1648_p12, %p1647_p11 }
  0x1e   : > { %s2455_s18 = scalar_select %p2046_p6, 1, 0 }
  0x1f   : > { %p2052_p7 = pneg %p2046_p6 }
  0x21   : > { %s2456_s19 = scalar_select %p2052_p7, 1, 0 }
  0x22   : > { %p1642_p9 = pnand %p1640_p8, %p2052_p7 }
  0x24   : > { %p1643_p10 = pneg %p1642_p9 }
  0x26   : > { %p1650_p0 = pnand %p1649_p13, %p1643_p10 }
  0x28   : > { %1653 = shalt.err (!%p1650_p0)
}
  0x29   : > { %s2422_s21 = smov 128   ;;  %s2425_s22 = smov 8  }
  0x2a   : > { %s2457_s5 = sld [smem:[#allocation31_spill]]  ;;  %s1665_s29 = scalar_lea.vmem %s405_s17, 512 }
  0x2b   : > { %p1666_p2 = scmp.ne.s32.totalorder %s405_s17, %s1665_s29  ;;  %p1673_p9 = scmp.lt.s32.totalorder %s405_s17, %s405_s17 }
  0x2c   : > { %p1674_p10 = scmp.lt.s32.totalorder %s1665_s29, %s1665_s29 }
  0x2d   : > { %p1668_p5 = pnand %p1666_p2, %p2052_p7 }
  0x2e   : > { %p1675_p11 = por %p1674_p10, %p1673_p9 }
  0x2f   : > { %p1669_p8 = pneg %p1668_p5 }
  0x30   : > { %1542 = dma.hbm_to_vmem [thread:$0]  (!%p2046_p6), %s2457_s5, 512, %s373_s30, [#allocation9], %s2422_s21, %s2422_s21, %s2425_s22  }
  0x31   : > { %p1676_p12 = pnand %p1675_p11, %p1669_p8 }
  0x33   : > { %1679 = shalt.err (!%p1676_p12)
}
  0x34   : > { %s2458_s9 = sld [smem:[#allocation33_spill]]  ;;  %s1377_s30 = sadd.s32 4294967294, %s1922_s28  }
  0x35   : > { %s2078_s23 = sadd.s32 1, %s1922_s28   ;;  %s42_s29 = sadd.s32 1, %s1918_s27 }
  0x36   : > { %2459 = sst [smem:[#allocation25_spill]] %s2078_s23  ;;  %s39_s24 = ssub.s32 %s1922_s28, %s2078_s23 }
  0x37   : > { %p40_p13 = scmp.eq.s32.totalorder %s39_s24, 0  ;;  %p49_p0 = scmp.ne.s32.totalorder %s1918_s27, %s1914_s26 }
  0x38   : > { %p50_p2 = scmp.eq.s32.totalorder %s1922_s28, 0  ;;  %p55_p5 = scmp.ne.s32.totalorder %s1914_s26, %s1910_s25 }
  0x39   : > { %s2089_s16 = scalar_select %p40_p13, %s1918_s27, %s42_s29  }
  0x3a   : > { %1548 = dma.hbm_to_vmem [thread:$0]  (!%p2046_p6), %s2458_s9, 512, %s405_s17, [#allocation12], %s2422_s21, %s2422_s21, %s2425_s22  }
  0x3b   : > { %2460 = sst [smem:[#allocation26_spill]] %s2089_s16  ;;  %p51_p8 = por %p50_p2, %p49_p0 }
  0x3c   : > { %p2093_p9 = por %p2436_p1, %p55_p5  ;;  %p341_p10 = scmp.eq.s32.totalorder %s2032_s14, 1 }
  0x3d   : > { %p347_p11 = scmp.eq.s32.totalorder %s1377_s30, 1  ;;  %p1574_p12 = scmp.lt.s32.totalorder %s1922_s28, 2 }
  0x3e   : > { %s2461_s20 = scalar_select %p2093_p9, 1, 0 }
  0x3f   : > { %s2429_s17 = sand.u32 1, %s1918_s27   ;;  %p2100_p4 = por %p341_p10, %p49_p0 }
  0x40   : > { %p2104_p3 = por %p347_p11, %p55_p5  ;;  %s2110_s29 = sshll.u32 %s2429_s17, 3 }
  0x41   : > { %s2462_s21 = scalar_select %p2100_p4, 1, 0 }
  0x42   : > { %s2464_s24 = scalar_select %p2104_p3, 1, 0 }
  0x43   : > { %2463 = sst [smem:[#allocation27_spill]] %s2462_s21  ;;  %s2113_s22 = sshll.u32 %s1922_s28, 7 }
  0x44   : > { %2465 = sst [smem:[#allocation28_spill]] %s2464_s24  ;;  %p2115_p13 = pnand %p1574_p12, %p51_p8 }
  0x45   : > { %s465_s30 = sand.u32 1, %s1922_s28   ;;  %s2467_s1 = sld [smem:[#allocation29_spill]] }
  0x46   : > { %s469_s17 = scalar_lea.vmem [#allocation5], %s2110_s29  ;;  %s1928_s25 = smov [#allocation10]  }
  0x47   : > { %s476_s24 = sshll.u32 %s469_s17, 4  ;;  %s388_s13 = sshll.u32 %s1928_s25, 4  ;;  %s2127_s24 = int_to_ptr.vmem [resolvable:$true] %s476_s24  ;;  %s389_s13 = int_to_ptr.vmem [resolvable:$true] %s388_s13 }
  0x48   : > { %s2129_s10 = scalar_lea.sflag [#allocation6], %s465_s30  ;;  %p2135_p2 = pneg %p2115_p13 }
  0x4a   : > { %s2468_s28 = scalar_select %p2135_p2, 1, 0 }
  0x4b   : > { %s2124_s23 = scalar_lea.hbm %s2467_s1, %s2113_s22  ;;  %s1685_s17 = scalar_lea.hbm %s2467_s1, 256 }
  0x4c   : > { %s1680_s21 = scalar_lea.hbm %s2124_s23, 128  ;;  %p1686_p10 = scmp.lt.s32.totalorder %s2124_s23, %s2467_s1 }
  0x4d   : > { %p1681_p0 = scmp.ne.s32.totalorder %s2124_s23, %s1680_s21  ;;  %p1687_p11 = scmp.lt.s32.totalorder %s1685_s17, %s1680_s21 }
  0x4f   : > { %p1683_p5 = pnand %p2135_p2, %p1681_p0  ;;  %p1688_p12 = por %p1687_p11, %p1686_p10 }
  0x51   : > { %p1684_p8 = pneg %p1683_p5 }
  0x53   : > { %p1689_p1 = pnand %p1688_p12, %p1684_p8 }
  0x55   : > { %1692 = shalt.err (!%p1689_p1)
}
  0x56   : > { %s1693_s25 = scalar_lea.vmem %s2127_s24, 128  ;;  %s1929_s30 = smov [#allocation5]  }
  0x57   : > { %p1694_p3 = scmp.ne.s32.totalorder %s2127_s24, %s1693_s25  ;;  %s1698_s9 = sshll.u32 %s1929_s30, 4  ;;  %s1699_s9 = int_to_ptr.vmem [resolvable:$false] %s1698_s9 }
  0x58   : > { %s1700_s16 = scalar_lea.vmem %s1699_s9, 256  ;;  %p1701_p4 = scmp.lt.s32.totalorder %s2127_s24, %s1699_s9 }
  0x59   : > { %p1696_p0 = pnand %p1694_p3, %p2135_p2  ;;  %p1702_p9 = scmp.lt.s32.totalorder %s1700_s16, %s1693_s25 }
  0x5b   : > { %p1697_p5 = pneg %p1696_p0  ;;  %p1703_p6 = por %p1702_p9, %p1701_p4 }
  0x5d   : > { %p1704_p7 = pnand %p1703_p6, %p1697_p5 }
  0x5f   : > { %1707 = shalt.err (!%p1704_p7)
}
  0x60   : > { %1561 = dma.hbm_to_vmem [thread:$0]  (!%p2115_p13), %s2124_s23, 128, %s2127_s24, %s2129_s10  }
  0x61   : > { %s1719_s4 = scalar_lea.vmem %s389_s13, 512  ;;  %p2469_p3 = scmp.ne.s32.totalorder %s2456_s19, 0 }
  0x62   : > { %p1720_p1 = scmp.ne.s32.totalorder %s389_s13, %s1719_s4  ;;  %p1727_p11 = scmp.lt.s32.totalorder %s389_s13, %s389_s13 }
  0x63   : > { %p1728_p12 = scmp.lt.s32.totalorder %s1719_s4, %s1719_s4 }
  0x64   : > { %p1722_p8 = pnand %p1720_p1, %p2469_p3 }
  0x65   : > { %p1729_p0 = por %p1728_p12, %p1727_p11 }
  0x66   : > { %p1723_p10 = pneg %p1722_p8 }
  0x68   : > { %p1730_p2 = pnand %p1729_p0, %p1723_p10 }
  0x6a   : > { %1733 = shalt.err (!%p1730_p2)
}
  0x6b   : > { %p2470_p4 = scmp.ne.s32.totalorder %s2455_s18, 0  ;;  %s2471_s8 = smov 8  }
  0x6c   : > { %s2472_s21 = smov 128   ;;  %s1930_s23 = smov [#allocation13]  }
  0x6d   : > { %1545 = dma.hbm_to_vmem [thread:$0]  (!%p2470_p4), %s2415_s7, 512, %s389_s13, [#allocation9], %s2472_s21, %s2472_s21, %s2471_s8  }
  0x6e   : > { %s420_s24 = sshll.u32 %s1930_s23, 4  ;;  %s1931_s30 = smov [#allocation14]   ;;  %s421_s24 = int_to_ptr.vmem [resolvable:$true] %s420_s24 }
  0x6f   : > { %s433_s9 = sshll.u32 %s1931_s30, 4  ;;  %s1745_s16 = scalar_lea.vmem %s421_s24, 512  ;;  %s434_s9 = int_to_ptr.vmem [resolvable:$true] %s433_s9 }
  0x70   : > { %p1746_p6 = scmp.ne.s32.totalorder %s421_s24, %s1745_s16  ;;  %p1753_p2 = scmp.lt.s32.totalorder %s421_s24, %s421_s24 }
  0x71   : > { %p1754_p5 = scmp.lt.s32.totalorder %s1745_s16, %s1745_s16 }
  0x72   : > { %p1748_p7 = pnand %p1746_p6, %p2469_p3 }
  0x73   : > { %p1755_p1 = por %p1754_p5, %p1753_p2 }
  0x74   : > { %p1749_p9 = pneg %p1748_p7 }
  0x76   : > { %p1756_p8 = pnand %p1755_p1, %p1749_p9 }
  0x78   : > { %1759 = shalt.err (!%p1756_p8)
}
  0x79   : > { %1551 = dma.hbm_to_vmem [thread:$0]  (!%p2470_p4), %s2419_s11, 512, %s421_s24, [#allocation12], %s2472_s21, %s2472_s21, %s2471_s8  }
  0x7a   : > { %s1771_s17 = scalar_lea.vmem %s434_s9, 512  ;;  %p1779_p0 = scmp.lt.s32.totalorder %s434_s9, %s434_s9 }
  0x7b   : > { %p1772_p10 = scmp.ne.s32.totalorder %s434_s9, %s1771_s17  ;;  %p1780_p6 = scmp.lt.s32.totalorder %s1771_s17, %s1771_s17 }
  0x7d   : > { %p1774_p11 = pnand %p1772_p10, %p2469_p3  ;;  %p1781_p7 = por %p1780_p6, %p1779_p0 }
  0x7f   : > { %p1775_p12 = pneg %p1774_p11 }
  0x81   : > { %p1782_p9 = pnand %p1781_p7, %p1775_p12 }
  0x83   : > { %1785 = shalt.err (!%p1782_p9)
}
  0x84   : > { %1554 = dma.hbm_to_vmem [thread:$0]  (!%p2470_p4), %s2420_s12, 512, %s434_s9, [#allocation15], %s2472_s21, %s2472_s21, %s2471_s8  }
  0x85   : > { %s2192_s30 = scalar_lea.hbm %s2408_s0, %s2113_s22  ;;  %s451_s18 = scalar_lea.vmem [#allocation2], %s2110_s29 }
  0x86   : > { %s458_s16 = sshll.u32 %s451_s18, 4  ;;  %s2199_s17 = scalar_lea.hbm %s2410_s2, %s2113_s22  ;;  %s459_s16 = int_to_ptr.vmem [resolvable:$true] %s458_s16 }
  0x87   : > { %s2473_s25 = sand.u32 1, %s1918_s27   ;;  %s1786_s1 = scalar_lea.hbm %s2192_s30, 128 }
  0x88   : > { %s448_s23 = scalar_lea.sflag [#allocation3], %s2473_s25  ;;  %p1787_p3 = scmp.ne.s32.totalorder %s2192_s30, %s1786_s1 }
  0x89   : > { %p2474_p4 = scmp.ne.s32.totalorder %s2468_s28, 0  ;;  %s1791_s9 = scalar_lea.hbm %s2408_s0, 256 }
  0x8a   : > { %p1792_p1 = scmp.lt.s32.totalorder %s2192_s30, %s2408_s0  ;;  %p1793_p8 = scmp.lt.s32.totalorder %s1791_s9, %s1786_s1 }
  0x8b   : > { %p1789_p2 = pnand %p1787_p3, %p2474_p4 }
  0x8c   : > { %p1794_p10 = por %p1793_p8, %p1792_p1 }
  0x8d   : > { %p1790_p5 = pneg %p1789_p2 }
  0x8f   : > { %p1795_p11 = pnand %p1794_p10, %p1790_p5 }
  0x91   : > { %1798 = shalt.err (!%p1795_p11)
}
  0x92   : > { %s1799_s22 = scalar_lea.vmem %s459_s16, 128  ;;  %s1932_s18 = smov [#allocation2]  }
  0x93   : > { %p1800_p12 = scmp.ne.s32.totalorder %s459_s16, %s1799_s22  ;;  %s1804_s13 = sshll.u32 %s1932_s18, 4  ;;  %s1805_s13 = int_to_ptr.vmem [resolvable:$false] %s1804_s13 }
  0x94   : > { %s1806_s4 = scalar_lea.vmem %s1805_s13, 256  ;;  %p1807_p7 = scmp.lt.s32.totalorder %s459_s16, %s1805_s13 }
  0x95   : > { %p1802_p0 = pnand %p1800_p12, %p2474_p4  ;;  %p1808_p9 = scmp.lt.s32.totalorder %s1806_s4, %s1799_s22 }
  0x97   : > { %p1803_p6 = pneg %p1802_p0  ;;  %p1809_p3 = por %p1808_p9, %p1807_p7 }
  0x99   : > { %p1810_p2 = pnand %p1809_p3, %p1803_p6 }
  0x9b   : > { %1813 = shalt.err (!%p1810_p2)
}
  0x9c   : > { %1558 = dma.hbm_to_vmem [thread:$0]  (!%p2115_p13), %s2192_s30, 128, %s459_s16, %s448_s23  }
  0x9d   : > { %s487_s1 = scalar_lea.vmem [#allocation7], %s2110_s29  ;;  %s1814_s8 = scalar_lea.hbm %s2199_s17, 128 }
  0x9e   : > { %s494_s25 = sshll.u32 %s487_s1, 4  ;;  %p1815_p5 = scmp.ne.s32.totalorder %s2199_s17, %s1814_s8  ;;  %s495_s25 = int_to_ptr.vmem [resolvable:$true] %s494_s25 }
  0x9f   : > { %s1819_s19 = scalar_lea.hbm %s2410_s2, 256  ;;  %p1820_p10 = scmp.lt.s32.totalorder %s2199_s17, %s2410_s2 }
  0xa0   : > { %p1817_p1 = pnand %p1815_p5, %p2474_p4  ;;  %p1821_p11 = scmp.lt.s32.totalorder %s1819_s19, %s1814_s8 }
  0xa2   : > { %p1818_p8 = pneg %p1817_p1  ;;  %p1822_p12 = por %p1821_p11, %p1820_p10 }
  0xa4   : > { %p1823_p0 = pnand %p1822_p12, %p1818_p8 }
  0xa6   : > { %1826 = shalt.err (!%p1823_p0)
}
  0xa7   : > { %s1827_s29 = scalar_lea.vmem %s495_s25, 128  ;;  %s1933_s30 = smov [#allocation7]  }
  0xa8   : > { %p1828_p6 = scmp.ne.s32.totalorder %s495_s25, %s1827_s29  ;;  %s1832_s16 = sshll.u32 %s1933_s30, 4  ;;  %s1833_s16 = int_to_ptr.vmem [resolvable:$false] %s1832_s16 }
  0xa9   : > { %s1834_s23 = scalar_lea.vmem %s1833_s16, 256  ;;  %p1835_p3 = scmp.lt.s32.totalorder %s495_s25, %s1833_s16 }
  0xaa   : > { %p1830_p7 = pnand %p1828_p6, %p2474_p4  ;;  %p1836_p2 = scmp.lt.s32.totalorder %s1834_s23, %s1827_s29 }
  0xac   : > { %p1831_p9 = pneg %p1830_p7  ;;  %p1837_p5 = por %p1836_p2, %p1835_p3 }
  0xae   : > { %p1838_p1 = pnand %p1837_p5, %p1831_p9 }
  0xb0   : > { %1841 = shalt.err (!%p1838_p1)
}
  0xb1   : > { %1564 = dma.hbm_to_vmem [thread:$0]  (!%p2115_p13), %s2199_s17, 128, %s495_s25, %s2129_s10  }
  0xb2   : > { %p2475_p8 = scmp.ne.s32.totalorder %s2454_s15, 0 }
  0xb3   : > { %s2240_s28 = sand.u32 (!%p2475_p8), 1, %s1914_s26   ;;  %p2476_p4 = scmp.ne.s32.totalorder (!%p2475_p8), %s2461_s20, 0 }
  0xb4   : > { %503 = sbr.rel (%p2475_p8) target bundleno = 1145 (0x479), region = 72  ;;  %s2243_s18 = sshll.u32 (!%p2475_p8), %s2240_s28, 3 }
  0xb5   : > { %s506_s13 = scalar_lea.sflag (!%p2475_p8), [#allocation3], %s2240_s28  ;;  %s509_s4 = scalar_lea.vmem (!%p2475_p8), [#allocation2], %s2243_s18 }
  0xb9   : > { %1885 = dma.done.wait (%p2476_p4), %s506_s13, 128  }
  0xba   : > { %1887 = vsyncadd (%p2476_p4), %s506_s13, 4294967168  ;;  %s514_s5 = sand.u32 1, %s2032_s14   ;;  %s518_s15 = scalar_lea.vmem [#allocation5], %s2243_s18 }
  0xbb   : > { %s515_s10 = scalar_lea.sflag [#allocation6], %s514_s5 }
  0xbc   : > { %1889 = dma.done.wait (%p2476_p4), %s515_s10, 256  }
  0xbd   : > { %1891 = vsyncadd (%p2476_p4), %s515_s10, 4294967040  ;;  %s527_s17 = scalar_lea.vmem [#allocation7], %s2243_s18  ;;  %p2477_p13 = scmp.eq.s32.totalorder %s2032_s14, 0 }
  0xbf   : > { %1893 = dma.done.wait (%p2477_p13), [#allocation9], 1024   ;;  %p2478_p10 = pmov %p2477_p13 }
  0xc1   : > { %1895 = vsyncadd (%p2478_p10), [#allocation9], 4294966272  ;;  %p2479_p11 = pmov %p2478_p10 }
  0xc2   : > { %p2480_p12 = pmov %p2478_p10 }
  0xc3   : > { %1897 = dma.done.wait (%p2479_p11), [#allocation12], 1024  }
  0xc4   : > { %1899 = vsyncadd (%p2480_p12), [#allocation12], 4294966272  ;;  %p2481_p0 = pmov %p2478_p10 }
  0xc6   : > { %1901 = dma.done.wait (%p2481_p0), [#allocation15], 512   ;;  %p2482_p6 = pmov %p2481_p0 }
  0xc7   : > { %v1934_v0 = vmov 0.0   ;;  %vm1935_vm0 = vmmov 0   ;;  %v1936_v1 = vmov 0   ;;  %v606_v2 = vld [vmem:[%s2411_s3 + $0x18] sm:$0xff]  ;;  %v605_v3 = vld [vmem:[%s2411_s3 + $0x10] sm:$0xff]  ;;  %v604_v4 = vld [vmem:[%s2411_s3 + $0x8] sm:$0xff] }
  0xc8   : > { %1903 = vsyncadd (%p2482_p6), [#allocation15], 4294966784  ;;  %1448 = vmatprep.subr.mxu0 %v1934_v0  ;;  %1456 = vmatprep.mubr.msk.f32.mxu0 %vm1935_vm0, %v1934_v0  ;;  %v777_v5 = vld [vmem:[%s2414_s6 + $0x8] sm:$0xff]  ;;  %v603_v6 = vld [vmem:[%s2411_s3] sm:$0xff]  ;;  %vm614_vm1 = vcmask 261120   ;;  %vm940_vm2 = vcmask 64512  }
  0xc9   : > { %1627 = vset.pattern.permute.xlu1 %v1936_v1  ;;  %1626 = vset.pattern.permute.xlu0 %v1936_v1  ;;  %v779_v7 = vld [vmem:[%s2414_s6 + $0x18] sm:$0xff]  ;;  %v600_v8 = vld [vmem:[%s509_s4] sm:$0xff]  ;;  %v772_v10 = vld [vmem:[#allocation8] sm:$0xff]  ;;  %s1937_s4 = smov 8   ;;  %vm950_vm3 = vcmask 195584   ;;  %vm945_vm4 = vcmask 130048  }
  0xca   : > { %1459 = vmatprep.subr.mxu1 %v1934_v0  ;;  %1467 = vmatprep.mubr.msk.f32.mxu1 %vm1935_vm0, %v1934_v0  ;;  %v601_v9 = vld [vmem:[%s518_s15] sm:$0xff]  ;;  %v776_v11 = vld [vmem:[%s2414_s6] sm:$0xff]  ;;  %v775_v15 = vld [vmem:[#allocation8 + $0x18] sm:$0xff]  ;;  %s1938_s15 = smov 16   ;;  %s2483_s25 = sld [smem:[#allocation30_spill]] }
  0xcb   : > { %1449 = vmatpush3.msra.mxu0 %v606_v2  ;;  %787 = vperm.xlu1 %1627, %v777_v5   ;;  %v778_v12 = vld [vmem:[%s2414_s6 + $0x10] sm:$0xff]  ;;  %v773_v13 = vld [vmem:[#allocation8 + $0x8] sm:$0xff]  ;;  %v774_v14 = vld [vmem:[#allocation8 + $0x10] sm:$0xff]  ;;  %s2484_s9 = sld [smem:[#allocation32_spill]]  ;;  %s1415_s30 = sshll.u32 %s2032_s14, 7 }
  0xcc   : > { %1450 = vmatprep.subr.mxu0 %v1934_v0  ;;  %797 = vperm.xlu0 %1626, %v779_v7   ;;  %v691_v16 = vld [vmem:[#allocation10 + $0x18] sm:$0xff]  ;;  %v690_v17 = vld [vmem:[#allocation10 + $0x10] sm:$0xff]  ;;  %v689_v20 = vld [vmem:[#allocation10 + $0x8] sm:$0xff]  ;;  %s2485_s19 = sld [smem:[#allocation27_spill]]  ;;  %s599_s16 = scalar_lea.vmem [#allocation16], %s2243_s18 }
  0xcd   : > { %1451 = vmatpush3.msra.mxu0 %v605_v3  ;;  %1460 = vmatpush3.msra.mxu1 %v691_v16  ;;  %v688_v22 = vld [vmem:[#allocation10] sm:$0xff]  ;;  %v602_v23 = vld [vmem:[%s527_s17] sm:$0xff]  ;;  %s1939_s17 = smov 24   ;;  %v956_v55 = vld [vmem:[#allocation13 + $0x8] sm:$0xff]  ;;  %s2486_s29 = sld [smem:[#allocation34_spill]] }
  0xce   : > { %1452 = vmatprep.subr.mxu0 %v1934_v0  ;;  %1461 = vmatprep.subr.mxu1 %v1934_v0  ;;  %v958_v42 = vld [vmem:[#allocation13 + $0x18] sm:$0xff]  ;;  %v957_v51 = vld [vmem:[#allocation13 + $0x10] sm:$0xff]  ;;  %v955_v61 = vld [vmem:[#allocation13] sm:$0xff]  ;;  %s1216_s23 = sshll.u32 %s599_s16, 4  ;;  %s2487_s10 = sld [smem:[#allocation35_spill]]  ;;  %s1217_s23 = int_to_ptr.vmem [resolvable:$true] %s1216_s23 }
  0xcf   : > { %1453 = vmatpush3.msra.mxu0 %v604_v4  ;;  %782 = vperm.xlu1 %1627, %v776_v11   ;;  %s1940_s14 = smov [#allocation16]  }
  0xd0   : > { %1454 = vmatprep.subr.mxu0 %v1934_v0  ;;  %792 = vperm.xlu0 %1626, %v778_v12   ;;  %v1401_v63 = vld [vmem:[%s2483_s25] ss:$0 sm:$0xff]  ;;  %v964_v12 = vld [vmem:[#allocation14 + $0x8] sm:$0xff]  ;;  %s1846_s18 = sshll.u32 %s1940_s14, 4  ;;  %s1847_s18 = int_to_ptr.vmem [resolvable:$false] %s1846_s18 }
  0xd1   : > { %1455 = vmatpush3.msra.mxu0 %v603_v6  ;;  %1462 = vmatpush3.msra.mxu1 %v690_v17  ;;  %v1403_v6 = vld [vmem:[%s2484_s9] ss:$0 sm:$0xff]  ;;  %s1848_s20 = scalar_lea.vmem %s1847_s18, 256  ;;  %p1849_p5 = scmp.lt.s32.totalorder %s1217_s23, %s1847_s18 }
  0xd2   : > { %1457 = vmatmul.mubr.msk.f32.vlgmr.msra.gmra.mxu0 %vm614_vm1, %v600_v8  ;;  %1470 = vmatprep.subr.msk.mxu0 %vm614_vm1, %v601_v9  ;;  %v966_v8 = vld [vmem:[#allocation14 + $0x18] sm:$0xff]  ;;  %p2488_p9 = scmp.ne.s32.totalorder %s2485_s19, 0 }
  0xd3   : > { %1471 = vmatpush3.xpose.msk.msra.mxu0 %vm614_vm1, %v601_v9  ;;  %1472 = vmatprep.mubr.msk.f32.mxu0 %vm614_vm1, %v772_v10  ;;  %v965_v9 = vld [vmem:[#allocation14 + $0x10] sm:$0xff] }
  0xd4   : > { %1489 = vmatprep.subr.mxu0 %v1934_v0  ;;  %1463 = vmatprep.subr.mxu1 %v1934_v0 }
  0xd5   : > { %1464 = vmatpush3.msra.mxu1 %v689_v20  ;;  %v1118_v20 = vld [vmem:[#allocation11 + $0x8] sm:$0xff] }
  0xd6   : > { %1473 = vmatmul.mubr.msk.f32.vlgmr.msra.gmra.mxu0 %vm614_vm1, %v773_v13  ;;  %1465 = vmatprep.subr.mxu1 %v1934_v0 }
  0xd7   : > { %1475 = vmatprep.mubr.msk.f32.mxu0 %vm614_vm1, %v774_v14  ;;  %1466 = vmatpush3.msra.mxu1 %v688_v22 }
  0xd8   : > { %1468 = vmatmul.mubr.msk.f32.vlgmr.msra.gmra.mxu1 %vm614_vm1, %v602_v23  ;;  %1478 = vmatprep.subr.mxu1 %v1934_v0  ;;  %v1117_v23 = vld [vmem:[#allocation11] sm:$0xff] }
  0xd9   : > { %1486 = vmatprep.mubr.msk.f32.mxu1 %vm1935_vm0, %v1934_v0 }
  0xda   : > { %1476 = vmatmul.mubr.msk.f32.gmra.mxu0 %vm614_vm1, %v775_v15  ;;  %v963_v15 = vld [vmem:[#allocation14] sm:$0xff] }
  0xdb   : > { %1497 = vmatprep.mubr.msk.f32.mxu0 %vm1935_vm0, %v1934_v0 }
 0x146   : > { %v788_v18 = vpop.permute.xlu1 %787 }
 0x147   : > { %v798_v26 = vpop.permute.xlu0 %797 }
 0x14a   : > { %v783_v27 = vpop.permute.xlu1 %782 }
 0x14b   : > { %v793_v32 = vpop.permute.xlu0 %792 }
 0x192   : > { %v2318_v19 = vpop.f32.mrf.mxu0 }
 0x193   : > { %v685_v5 = vadd.f32 %v1401_v63, %v2318_v19  ;;  %v1119_v19 = vld [vmem:[#allocation11 + $0x10] sm:$0xff] }
 0x194   : > { %v1458_v21 = vpop.f32.mrf.mxu0 }
 0x196   : > { %v1474_v24 = vpop.f32.mrf.mxu0 }
 0x197   : > { %v887_v25 = vadd.f32 %v1474_v24, %v788_v18  ;;  %v1120_v18 = vld [vmem:[#allocation11 + $0x18] sm:$0xff] }
 0x198   : > { %v881_v28 = vpop.f32.mrf.mxu0  ;;  %v768_v7 = vpop.f32.mrf.mxu1 }
 0x199   : > { %v882_v29 = vadd.f32 %v881_v28, %v783_v27  ;;  %906 = vrot.lane.b32.xlu1 %v887_v25, %s1937_s4  ;;  %v769_v10 = vadd.f32 %v1403_v6, %v768_v7 }
 0x19a   : > { %v1477_v30 = vpop.f32.mrf.mxu0  ;;  %v1469_v11 = vpop.f32.mrf.mxu1 }
 0x19b   : > { %v897_v31 = vadd.f32 %v1477_v30, %v798_v26  ;;  %904 = vrot.lane.b32.xlu0 %v882_v29, %s1937_s4  ;;  %v970_v13 = vmul.f32 %v966_v8, %v769_v10  ;;  %v969_v14 = vmul.f32 %v965_v9, %v769_v10  ;;  %v968_v16 = vmul.f32 %v964_v12, %v769_v10  ;;  %v1412_v26 = vld [vmem:[%s2486_s29] ss:$0 sm:$0xff] }
 0x19c   : > { %v891_v33 = vpop.f32.mrf.mxu0  ;;  %v967_v17 = vmul.f32 %v963_v15, %v769_v10 }
 0x19d   : > { %918 = vrot.lane.b32.xlu1 %v887_v25, %s1938_s15  ;;  %v892_v34 = vadd.f32 %v891_v33, %v793_v32  ;;  %1490 = vmatpush3.msra.mxu0 %v970_v13 }
 0x19e   : > { %1491 = vmatprep.subr.mxu0 %v1934_v0 }
 0x19f   : > { %910 = vrot.lane.b32.xlu0 %v897_v31, %s1937_s4  ;;  %1492 = vmatpush3.msra.mxu0 %v969_v14 }
 0x1a0   : > { %1493 = vmatprep.subr.mxu0 %v1934_v0 }
 0x1a1   : > { %922 = vrot.lane.b32.xlu1 %v897_v31, %s1938_s15  ;;  %1494 = vmatpush3.msra.mxu0 %v968_v16 }
 0x1a2   : > { %1495 = vmatprep.subr.mxu0 %v1934_v0 }
 0x1a3   : > { %908 = vrot.lane.b32.xlu0 %v892_v34, %s1937_s4  ;;  %1496 = vmatpush3.msra.mxu0 %v967_v17  ;;  %s2370_s4 = scalar_lea.hbm %s2487_s10, %s1415_s30 }
 0x1a5   : > { %934 = vrot.lane.b32.xlu1 %v897_v31, %s1939_s17 }
 0x1a7   : > { %920 = vrot.lane.b32.xlu0 %v892_v34, %s1938_s15 }
 0x1a9   : > { %930 = vrot.lane.b32.xlu1 %v887_v25, %s1939_s17 }
 0x1ab   : > { %932 = vrot.lane.b32.xlu0 %v892_v34, %s1939_s17 }
 0x1ad   : > { %928 = vrot.lane.b32.xlu1 %v882_v29, %s1939_s17  ;;  %s1842_s17 = scalar_lea.vmem %s1217_s23, 128 }
 0x1ae   : > { %p1843_p7 = scmp.ne.s32.totalorder %s1217_s23, %s1842_s17  ;;  %p1850_p1 = scmp.lt.s32.totalorder %s1848_s20, %s1842_s17 }
 0x1af   : > { %916 = vrot.lane.b32.xlu0 %v882_v29, %s1938_s15  ;;  %s1203_s15 = scalar_lea.sflag [#allocation4], %s2240_s28 }
 0x1b0   : > { %p1844_p3 = pnand %p1843_p7, %p2488_p9  ;;  %p1851_p8 = por %p1850_p1, %p1849_p5 }
 0x1b2   : > { %p1845_p2 = pneg %p1844_p3 }
 0x1b4   : > { %p1852_p4 = pnand %p1851_p8, %p1845_p2 }
 0x20b   : > { %v907_v35 = vpop.permute.xlu1 %906 }
 0x20c   : > { %v942_v49 = vsel %vm940_vm2, %v887_v25, %v907_v35 }
 0x20d   : > { %v905_v36 = vpop.permute.xlu0 %904 }
 0x20e   : > { %v941_v59 = vsel %vm940_vm2, %v882_v29, %v905_v36 }
 0x20f   : > { %v919_v37 = vpop.permute.xlu1 %918 }
 0x210   : > { %v947_v52 = vsel %vm945_vm4, %v942_v49, %v919_v37 }
 0x211   : > { %v911_v38 = vpop.permute.xlu0 %910 }
 0x212   : > { %v944_v40 = vsel %vm940_vm2, %v897_v31, %v911_v38 }
 0x213   : > { %v923_v39 = vpop.permute.xlu1 %922 }
 0x214   : > { %v949_v43 = vsel %vm945_vm4, %v944_v40, %v923_v39 }
 0x215   : > { %v909_v41 = vpop.permute.xlu0 %908 }
 0x216   : > { %v943_v50 = vsel %vm940_vm2, %v892_v34, %v909_v41 }
 0x217   : > { %v935_v44 = vpop.permute.xlu1 %934 }
 0x218   : > { %v954_v45 = vsel %vm950_vm3, %v949_v43, %v935_v44 }
 0x219   : > { %v962_v46 = vmul.f32 %v958_v42, %v954_v45  ;;  %v921_v47 = vpop.permute.xlu0 %920 }
 0x21a   : > { %v948_v53 = vsel %vm945_vm4, %v943_v50, %v921_v47 }
 0x21b   : > { %v931_v48 = vpop.permute.xlu1 %930  ;;  %1479 = vmatpush3.msra.mxu1 %v962_v46 }
 0x21c   : > { %1480 = vmatprep.subr.mxu1 %v1934_v0  ;;  %v952_v56 = vsel %vm950_vm3, %v947_v52, %v931_v48 }
 0x21d   : > { %v933_v54 = vpop.permute.xlu0 %932  ;;  %v960_v60 = vmul.f32 %v956_v55, %v952_v56 }
 0x21e   : > { %v953_v57 = vsel %vm950_vm3, %v948_v53, %v933_v54 }
 0x21f   : > { %v961_v58 = vmul.f32 %v957_v51, %v953_v57  ;;  %v929_v1 = vpop.permute.xlu1 %928 }
 0x221   : > { %1481 = vmatpush3.msra.mxu1 %v961_v58  ;;  %v917_v62 = vpop.permute.xlu0 %916 }
 0x222   : > { %v946_v2 = vsel %vm945_vm4, %v941_v59, %v917_v62  ;;  %1482 = vmatprep.subr.mxu1 %v1934_v0 }
 0x223   : > { %v951_v3 = vsel %vm950_vm3, %v946_v2, %v929_v1  ;;  %1483 = vmatpush3.msra.mxu1 %v960_v60 }
 0x224   : > { %v959_v4 = vmul.f32 %v955_v61, %v951_v3  ;;  %1484 = vmatprep.subr.mxu1 %v1934_v0 }
 0x226   : > { %1485 = vmatpush3.msra.mxu1 %v959_v4 }
 0x227   : > { %1487 = vmatmul.mubr.msk.f32.vlgmr.msra.gmra.mxu1 %vm614_vm1, %v685_v5  ;;  %1500 = vmatprep.subr.mxu1 %v1934_v0 }
 0x228   : > { %1508 = vmatprep.mubr.msk.f32.mxu1 %vm1935_vm0, %v1934_v0  ;;  %1501 = vmatpush3.msra.mxu1 %v1120_v18 }
 0x229   : > { %1502 = vmatprep.subr.mxu1 %v1934_v0 }
 0x22a   : > { %1503 = vmatpush3.msra.mxu1 %v1119_v19 }
 0x22b   : > { %1504 = vmatprep.subr.mxu1 %v1934_v0 }
 0x22c   : > { %1505 = vmatpush3.msra.mxu1 %v1118_v20 }
 0x22d   : > { %1506 = vmatprep.subr.mxu1 %v1934_v0 }
 0x22e   : > { %1507 = vmatpush3.msra.mxu1 %v1117_v23 }
 0x2e7   : > { %v1040_v21 = vpop.f32.mrf.mxu1 }
 0x2e8   : > { %1498 = vmatmul.mubr.msk.f32.vlgmr.msra.gmra.mxu0 %vm614_vm1, %v1040_v21 }
 0x2e9   : > { %v1488_v22 = vpop.f32.mrf.mxu1 }
 0x3a8   : > { %v1113_v24 = vpop.f32.mrf.mxu0 }
 0x3a9   : > { %1509 = vmatmul.mubr.msk.f32.vlgmr.msra.gmra.mxu1 %vm614_vm1, %v1113_v24 }
 0x3aa   : > { %v1499_v25 = vpop.f32.mrf.mxu0 }
 0x469   : > { %v1197_v0 = vpop.f32.mrf.mxu1 }
 0x46a   : > { %v1198_v27 = vadd.f32 %v1412_v26, %v1197_v0 }
 0x46b   : > { %v1510_v28 = vpop.f32.mrf.mxu1 }
 0x46c   : > { %1201 = vst.msk [vmem:[%s599_s16] sm:$0xff] %vm614_vm1, %v1198_v27 }
 0x46d   : > { %1855 = shalt.err (!%p1852_p4)
}
 0x46e   : > { %s1856_s1 = scalar_lea.hbm %s2370_s4, 128  ;;  %s1860_s8 = scalar_lea.hbm %s2487_s10, 256 }
 0x46f   : > { %p1857_p13 = scmp.ne.s32.totalorder %s2370_s4, %s1856_s1  ;;  %p1861_p12 = scmp.lt.s32.totalorder %s2370_s4, %s2487_s10 }
 0x470   : > { %p1862_p0 = scmp.lt.s32.totalorder %s1860_s8, %s1856_s1 }
 0x471   : > { %p1858_p10 = pnand %p1857_p13, %p2488_p9 }
 0x472   : > { %p1863_p6 = por %p1862_p0, %p1861_p12 }
 0x473   : > { %p1859_p11 = pneg %p1858_p10 }
 0x475   : > { %p1864_p7 = pnand %p1863_p6, %p1859_p11 }
 0x477   : > { %1867 = shalt.err (!%p1864_p7)
}
 0x478   : > { %1537 = dma.vmem_to_hbm [thread:$0]  (%p2488_p9), %s1217_s23, 128, %s2370_s4, %s1203_s15  }
 0x479 PF: > { %s2489_s24 = sld [smem:[#allocation23_spill]] }
 0x47a   : > { %s2490_s22 = sld [smem:[#allocation28_spill]] }
 0x47b   : > { %s2491_s29 = sld [smem:[#allocation24_spill]] }
 0x47f   : > { %s1228_s30 = sand.u32 1, %s2489_s24  }
 0x480   : > { %p2492_p3 = scmp.ne.s32.totalorder %s2490_s22, 0  ;;  %s1229_s16 = scalar_lea.sflag [#allocation4], %s1228_s30 }
 0x481   : > { %p2493_p2 = scmp.ge.s32.totalorder %s2491_s29, 2 }
 0x483   : > { %p1566_p5 = pnand %p2493_p2, %p2492_p3 }
 0x485   : > { %p1567_p1 = pneg %p1566_p5 }
 0x487   : > { %1905 = dma.done.wait (%p1567_p1), %s1229_s16, 128  }
 0x488   : > { %1907 = vsyncadd (%p1567_p1), %s1229_s16, 4294967168  ;;  %s2494_s28 = sld [smem:[#allocation25_spill]]  ;;  %s2496_s25 = smov %s1914_s26 }
 0x489   : > { %s2495_s13 = sld [smem:[#allocation26_spill]]  ;;  %s2497_s26 = smov %s1918_s27 }
 0x48e   : > { %p32_p8 = scmp.ge.s32.totalorder %s2494_s28, 4  }
 0x48f   : > { %s2498_s27 = smov %s2495_s13 }
 0x490   :  { %34 = sbr.rel (!%p32_p8) target bundleno = 18 (0x12), region = 161 }
 0x495   :  { %1234 = vsyncpa [#allocation3], 1 }
 0x496   :  { %1236 = vsyncpa [#allocation3 + $0x1], 1 }
 0x497   :  { %1237 = vsyncpa [#allocation6], 1 }
 0x498   :  { %1239 = vsyncpa [#allocation6 + $0x1], 1 }
 0x499   :  { %1240 = vsyncpa [#allocation9], 1 }
 0x49a   :  { %1241 = vsyncpa [#allocation12], 1 }
 0x49b   :  { %1242 = vsyncpa [#allocation15], 1 }
 0x49c   :  { %1243 = vsyncpa [#allocation4], 1 }
 0x49d   :  { %1245 = vsyncpa [#allocation4 + $0x1], 1 }

</bundles_post_ra>
